<compile_context>
chip_gen: v7x
topology: tpu7x:2x2x1
jax: 0.10.0
libtpu: 0.0.40
codegen_flags: <defaults>
</compile_context>

<pallas_src>
import functools
import math

import jax
import jax.numpy as jnp
from jax import lax
from jax.experimental import pallas as pl
from jax.experimental.pallas import tpu as pltpu


def _self_attn_kernel(x_ref, wqkv_ref, o_ref, *, d_out):
    """One batch element per grid step.

    x_ref:    (1, T, d_in)    bf16 activations
    wqkv_ref: (d_in, 3*d_out) bf16 fused weights; 1/sqrt(d_out) pre-folded
              into the W_q columns at parameter-prep time.
    o_ref:    (1, T, d_out)   f32 output
    """
    x = x_ref[0]                                             # (T, d_in) bf16

    # QKV projection: three MXU pushes against static ref slices of the fused
    # weight (no lane-offset slicing of a computed 96-wide result).
    # bf16 operands, f32 accumulation.
    q = jnp.dot(x, wqkv_ref[:, :d_out],
                preferred_element_type=jnp.float32)          # already scaled
    k = jnp.dot(x, wqkv_ref[:, d_out:2 * d_out],
                preferred_element_type=jnp.float32)
    v = jnp.dot(x, wqkv_ref[:, 2 * d_out:],
                preferred_element_type=jnp.float32)

    # scores[i, j] = sum_d q[i, d] * k[j, d] -- contraction over the feature
    # axes, no explicit k transpose. bf16 MXU operands, f32 accumulation.
    scores = lax.dot_general(
        q.astype(jnp.bfloat16), k.astype(jnp.bfloat16),
        dimension_numbers=(((1,), (1,)), ((), ())),
        preferred_element_type=jnp.float32)                  # (T, T) f32

    # Numerically stable softmax over the key axis; all elementwise math in
    # f32 (v5e has no bf16 VPU/EUP). Exact divide -- approx reciprocal dropped.
    m = jnp.max(scores, axis=-1, keepdims=True)
    e = jnp.exp(scores - m)
    attn = e / jnp.sum(e, axis=-1, keepdims=True)            # (T, T) f32

    # context = attn @ v.
    ctx = jnp.dot(attn.astype(jnp.bfloat16), v.astype(jnp.bfloat16),
                  preferred_element_type=jnp.float32)        # (T, d_out) f32

    o_ref[0] = ctx.astype(o_ref.dtype)


def fuse_qkv_weights(wq_t, wk_t, wv_t):
    """ONE-TIME parameter prep (do not run per call).

    Fuses the three (d_in, d_out) projection matrices into a single
    (d_in, 3*d_out) bf16 matrix and folds 1/sqrt(d_out) into the W_q columns,
    so the kernel needs neither a per-call concat nor a per-element q scale.
    """
    d_out = wq_t.shape[1]
    scale = 1.0 / math.sqrt(d_out)
    w_qkv = jnp.concatenate([wq_t * scale, wk_t, wv_t], axis=1)
    return w_qkv.astype(jnp.bfloat16)


@jax.jit
def self_attention_v2(x, w_qkv):
    """x: (B, T, d_in) f32; w_qkv: (d_in, 3*d_out) bf16 from fuse_qkv_weights.

    Each batch element attends independently (equivalent to calling the 2-D
    PyTorch forward on every x[b]).
    """
    B, T, d_in = x.shape
    d_out = w_qkv.shape[1] // 3

    # bf16 activations: native MXU dtype everywhere and half the DMA bytes for
    # this launch/DMA-bound size. Softmax math stays f32 inside the kernel.
    x_bf16 = x.astype(jnp.bfloat16)

    grid_spec = pltpu.PrefetchScalarGridSpec(
        num_scalar_prefetch=0,
        # One batch element per step; "parallel" lets megacore chips (v7x)
        # split the batch across TensorCores. The weight block index is
        # constant, so the weights are DMA'd once and kept resident.
        grid=(B,),
        in_specs=[
            pl.BlockSpec((1, T, d_in), lambda b: (b, 0, 0)),
            pl.BlockSpec((d_in, 3 * d_out), lambda b: (0, 0)),
        ],
        out_specs=pl.BlockSpec((1, T, d_out), lambda b: (b, 0, 0)),
    )

    cost = pl.CostEstimate(
        flops=2 * B * T * d_in * 3 * d_out        # QKV projection
        + 2 * B * T * T * d_out                   # q @ k.T
        + 2 * B * T * T * d_out,                  # attn @ v
        transcendentals=B * T * T,                # exp in softmax
        bytes_accessed=x_bf16.size * 2 + w_qkv.size * 2 + B * T * d_out * 4,
    )

    kernel = functools.partial(_self_attn_kernel, d_out=d_out)

    return pl.pallas_call(
        kernel,
        out_shape=jax.ShapeDtypeStruct((B, T, d_out), x.dtype),
        grid_spec=grid_spec,
        compiler_params=pltpu.CompilerParams(
            dimension_semantics=("parallel",)),
        cost_estimate=cost,
    )(x_bf16, w_qkv)


def _reference_attention(x, wq_t, wk_t, wv_t):
    """Pure-JAX f32 reference mirroring SelfAttentionV2.forward."""
    q = x @ wq_t
    k = x @ wk_t
    v = x @ wv_t
    scores = jnp.einsum("btd,bsd->bts", q, k)
    w = jax.nn.softmax(scores / math.sqrt(k.shape[-1]), axis=-1)
    return jnp.einsum("bts,bsd->btd", w, v)


if __name__ == "__main__":
    # Small shapes consistent with the module's forward.
    B, T, d_in, d_out = 2, 8, 32, 32

    key = jax.random.PRNGKey(0)
    kx, kq, kk, kv = jax.random.split(key, 4)

    x = jax.random.normal(kx, (B, T, d_in), dtype=jnp.float32)

    # Deterministic nn.Linear-style init: W ~ U(-1/sqrt(d_in), 1/sqrt(d_in)),
    # shape (d_out, d_in); kernel consumes the transposed (d_in, d_out) form.
    bound = 1.0 / math.sqrt(d_in)
    wq = jax.random.uniform(kq, (d_out, d_in), jnp.float32, -bound, bound)
    wk = jax.random.uniform(kk, (d_out, d_in), jnp.float32, -bound, bound)
    wv = jax.random.uniform(kv, (d_out, d_in), jnp.float32, -bound, bound)

    # One-time parameter prep, hoisted out of the per-call path.
    w_qkv = fuse_qkv_weights(wq.T, wk.T, wv.T)

    out = jax.block_until_ready(self_attention_v2(x, w_qkv))

    ref = _reference_attention(x, wq.T, wk.T, wv.T)
    assert out.shape == (B, T, d_out)
    # Tolerance reflects the intentional bf16 MXU-operand cast (f32
    # accumulation + f32 softmax); the approximate reciprocal is gone.
    assert jnp.allclose(out, ref, atol=2e-2, rtol=2e-2), "mismatch vs reference"

    print("KERNEL_OK")
</pallas_src>

<mosaic_0001>
module attributes {stable_mosaic.version = 11 : i64} {
  func.func @_self_attn_kernel(%arg0: i32, %arg1: memref<1x8x32xbf16, #tpu.memory_space<vmem>>, %arg2: memref<32x96xbf16, #tpu.memory_space<vmem>>, %arg3: memref<1x8x32xf32, #tpu.memory_space<vmem>>) attributes {dimension_semantics = [#tpu.dimension_semantics<parallel>], iteration_bounds = array<i64: 2>, scalar_prefetch = 0 : i64, scratch_operands = 0 : i64, tpu.core_type = #tpu.core_type<tc>, window_params = [{transform_indices = @transform_0, window_bounds = array<i64: 1, 8, 32>}, {pipeline_mode = #tpu.pipeline_mode<synchronous>, transform_indices = @transform_1, window_bounds = array<i64: 32, 96>}, {transform_indices = @transform_2, window_bounds = array<i64: 1, 8, 32>}]} {
    %c0 = arith.constant 0 : index
    %c0_0 = arith.constant 0 : index
    %c0_1 = arith.constant 0 : index
    %0 = vector.load %arg1[%c0, %c0_0, %c0_1] : memref<1x8x32xbf16, #tpu.memory_space<vmem>>, vector<1x8x32xbf16>
    %1 = vector.shape_cast %0 : vector<1x8x32xbf16> to vector<8x32xbf16>
    %c0_2 = arith.constant 0 : index
    %c0_3 = arith.constant 0 : index
    %2 = vector.load %arg2[%c0_2, %c0_3] : memref<32x96xbf16, #tpu.memory_space<vmem>>, vector<32x32xbf16>
    %cst = arith.constant dense<0.000000e+00> : vector<8x32xf32>
    %3 = tpu.matmul %1, %2, %cst {dimension_numbers = #tpu.dot_dimension_numbers<[1], [0], [0], [1], [0, 0, 1, 1], [], []>} : vector<8x32xbf16>, vector<32x32xbf16>, vector<8x32xf32> -> vector<8x32xf32>
    %c0_4 = arith.constant 0 : index
    %c32 = arith.constant 32 : index
    %4 = vector.load %arg2[%c0_4, %c32] : memref<32x96xbf16, #tpu.memory_space<vmem>>, vector<32x32xbf16>
    %cst_5 = arith.constant dense<0.000000e+00> : vector<8x32xf32>
    %5 = tpu.matmul %1, %4, %cst_5 {dimension_numbers = #tpu.dot_dimension_numbers<[1], [0], [0], [1], [0, 0, 1, 1], [], []>} : vector<8x32xbf16>, vector<32x32xbf16>, vector<8x32xf32> -> vector<8x32xf32>
    %c0_6 = arith.constant 0 : index
    %c64 = arith.constant 64 : index
    %6 = vector.load %arg2[%c0_6, %c64] : memref<32x96xbf16, #tpu.memory_space<vmem>>, vector<32x32xbf16>
    %cst_7 = arith.constant dense<0.000000e+00> : vector<8x32xf32>
    %7 = tpu.matmul %1, %6, %cst_7 {dimension_numbers = #tpu.dot_dimension_numbers<[1], [0], [0], [1], [0, 0, 1, 1], [], []>} : vector<8x32xbf16>, vector<32x32xbf16>, vector<8x32xf32> -> vector<8x32xf32>
    %8 = arith.truncf %3 : vector<8x32xf32> to vector<8x32xbf16>
    %9 = arith.truncf %5 : vector<8x32xf32> to vector<8x32xbf16>
    %cst_8 = arith.constant dense<0.000000e+00> : vector<8x8xf32>
    %10 = tpu.matmul %8, %9, %cst_8 {dimension_numbers = #tpu.dot_dimension_numbers<[1], [1], [0], [0], [0, 0, 1, 0], [], []>} : vector<8x32xbf16>, vector<8x32xbf16>, vector<8x8xf32> -> vector<8x8xf32>
    %cst_9 = arith.constant dense<0xFF800000> : vector<8xf32>
    %11 = vector.multi_reduction <maximumf>, %10, %cst_9 [1] : vector<8x8xf32> to vector<8xf32>
    %12 = vector.shape_cast %11 : vector<8xf32> to vector<8x1xf32>
    %13 = vector.broadcast %12 : vector<8x1xf32> to vector<8x8xf32>
    %14 = arith.subf %10, %13 : vector<8x8xf32>
    %15 = math.exp %14 : vector<8x8xf32>
    %cst_10 = arith.constant dense<0.000000e+00> : vector<8xf32>
    %16 = vector.multi_reduction <add>, %15, %cst_10 [1] : vector<8x8xf32> to vector<8xf32>
    %17 = vector.shape_cast %16 : vector<8xf32> to vector<8x1xf32>
    %18 = vector.broadcast %17 : vector<8x1xf32> to vector<8x8xf32>
    %19 = arith.divf %15, %18 : vector<8x8xf32>
    %20 = arith.truncf %19 : vector<8x8xf32> to vector<8x8xbf16>
    %21 = arith.truncf %7 : vector<8x32xf32> to vector<8x32xbf16>
    %cst_11 = arith.constant dense<0.000000e+00> : vector<8x32xf32>
    %22 = tpu.matmul %20, %21, %cst_11 {dimension_numbers = #tpu.dot_dimension_numbers<[1], [0], [0], [1], [0, 0, 1, 1], [], []>} : vector<8x8xbf16>, vector<8x32xbf16>, vector<8x32xf32> -> vector<8x32xf32>
    %c0_12 = arith.constant 0 : index
    %c0_13 = arith.constant 0 : index
    %c0_14 = arith.constant 0 : index
    %23 = vector.load %arg3[%c0_12, %c0_13, %c0_14] : memref<1x8x32xf32, #tpu.memory_space<vmem>>, vector<1x8x32xf32>
    %24 = vector.shape_cast %23 : vector<1x8x32xf32> to vector<8x32xf32>
    %25 = vector.shape_cast %22 : vector<8x32xf32> to vector<1x8x32xf32>
    tpu.vector_store %arg3[%c0_12, %c0_13, %c0_14], %25 {strides = array<i32>} : memref<1x8x32xf32, #tpu.memory_space<vmem>>, vector<1x8x32xf32>,
    return
  }
  func.func @transform_0(%arg0: i32) -> (i32, i32, i32) {
    %c0_i32 = arith.constant 0 : i32
    %c0_i32_0 = arith.constant 0 : i32
    %c0_i32_1 = arith.constant 0 : i32
    return %arg0, %c0_i32, %c0_i32_0 : i32, i32, i32
  }
  func.func @transform_1(%arg0: i32) -> (i32, i32) {
    %c0_i32 = arith.constant 0 : i32
    %c0_i32_0 = arith.constant 0 : i32
    %c0_i32_1 = arith.constant 0 : i32
    return %c0_i32, %c0_i32_0 : i32, i32
  }
  func.func @transform_2(%arg0: i32) -> (i32, i32, i32) {
    %c0_i32 = arith.constant 0 : i32
    %c0_i32_0 = arith.constant 0 : i32
    %c0_i32_1 = arith.constant 0 : i32
    return %arg0, %c0_i32, %c0_i32_0 : i32, i32, i32
  }
}

</mosaic_0001>

<bundles_post_ra>
// kernel: self_attention_v2.1
= control target key start
LH: loop header
LB: loop body
LE: loop exit
PB: predicated region body
PF: predicated region fallthrough
CT: control target
= control target key end

     0   :  { %7 = vsyncpa [#allocation3], 0  ;;  %s795_s0 = inlined_call_operand.vmem [shape: bf16[2,8,32], index: 0, kind: input, shape index: {}]   ;;  %s796_s1 = inlined_call_operand.vmem [shape: bf16[32,96], index: 1, kind: input, shape index: {}]   ;;  %s797_s2 = inlined_call_operand.hbm [shape: f32[2,8,32], index: 2, kind: output, shape index: {}]  }
   0x1   :  { %9 = vsyncpa [#allocation3 + $0x1], 0  ;;  %s675_s9 = smov 0   ;;  %s677_s10 = smov 0  }
   0x2   :  { %s679_s11 = smov 0   ;;  %s681_s12 = smov 0  }
   0x3 LB: > { %s696_s13 = sadd.s32 4294967295, %s653_s12   ;;  %s476_s14 = sadd.s32 4294967294, %s653_s12   ;;  %s653_s12 = sphi %s681_s12, %s803_s12   ;;  %s649_s11 = sphi %s679_s11, %s802_s11   ;;  %s645_s10 = sphi %s677_s10, %s801_s10   ;;  %s641_s9 = sphi %s675_s9, %s800_s9  }
   0x4   : > { %s700_s15 = sadd.s32 1, %s653_s12   ;;  %s69_s16 = sadd.s32 1, %s649_s11 }
   0x5   : > { %s66_s17 = ssub.s32 %s653_s12, %s700_s15  ;;  %p79_p0 = scmp.ne.s32.totalorder %s649_s11, %s645_s10 }
   0x6   : > { %p67_p1 = scmp.eq.s32.totalorder %s66_s17, 0  ;;  %p80_p2 = scmp.eq.s32.totalorder %s696_s13, 1 }
   0x7   : > { %p85_p3 = scmp.ne.s32.totalorder %s645_s10, %s641_s9  ;;  %p86_p4 = scmp.eq.s32.totalorder %s476_s14, 1 }
   0x8   : > { %s711_s18 = scalar_select %p67_p1, %s649_s11, %s69_s16  }
   0x9   : > { %p713_p5 = por %p80_p2, %p79_p0  ;;  %p717_p6 = por %p86_p4, %p85_p3 }
   0xa   : > { %p479_p7 = scmp.ge.s32.totalorder %s653_s12, 1  ;;  %p114_p8 = scmp.lt.s32.totalorder %s653_s12, 3 }
   0xc   : > { %p115_p9 = pnand %p479_p7, %p114_p8 }
   0xd   : > { %v585_v0 = vld [vmem:[%s796_s1] sm:$0xff] (!%p115_p9)   ;;  %s655_s23 = smov (!%p115_p9), 96   ;;  %v586_v1 = vld [vmem:[%s796_s1 + $0x8] sm:$0xff] (!%p115_p9)   ;;  %v656_v2 = vmov (!%p115_p9), 0.0   ;;  %p135_p10 = scmp.lt.s32.totalorder (!%p115_p9), %s696_s13, 1  ;;  %vm657_vm0 = vmmov (!%p115_p9), 0  }
   0xe   : > { %118 = sbr.rel (%p115_p9) target bundleno = 1113 (0x459), region = 28  ;;  %201 = vrot.lane.b32.xlu0 (!%p115_p9), %v585_v0, %s655_s23  ;;  %514 = vmatprep.subr.bf16.mxu1 (!%p115_p9), %v656_v2  ;;  %vm157_vm1 = vcmask (!%p115_p9), 261120   ;;  %s658_s3 = smov (!%p115_p9), 64   ;;  %vm341_vm2 = vcmask (!%p115_p9), 64512   ;;  %vm358_vm3 = vcmask (!%p115_p9), 1043456  }
   0xf   : > { %506 = vmatprep.subr.bf16.mxu0 (!%p115_p9), %v656_v2  ;;  %518 = vmatprep.mubr.msk.bf16.mxu1 (!%p115_p9), %vm657_vm0, %v656_v2  ;;  %s132_s4 = sand.u32 (!%p115_p9), 1, %s645_s10   ;;  %s490_s6 = sshll.u32 (!%p115_p9), %s696_s13, 7 }
  0x10   : > { %507 = vmatpush3.bf16.msra.mxu0 (!%p115_p9), %v585_v0  ;;  %510 = vmatprep.mubr.msk.bf16.mxu0 (!%p115_p9), %vm657_vm0, %v656_v2  ;;  %s480_s5 = sshll.u32 (!%p115_p9), %s132_s4, 3  ;;  %s752_s17 = scalar_lea.hbm (!%p115_p9), %s797_s2, %s490_s6 }
  0x11   : > { %508 = vmatprep.subr.bf16.mxu0 (!%p115_p9), %v656_v2  ;;  %247 = vrot.lane.b32.xlu1 (!%p115_p9), %v585_v0, %s658_s3  ;;  %s134_s7 = scalar_lea.vmem (!%p115_p9), [#allocation2], %s480_s5  ;;  %s404_s21 = scalar_lea.sflag (!%p115_p9), [#allocation3], %s132_s4 }
  0x12   : > { %203 = vrot.lane.b32.xlu0 (!%p115_p9), %v586_v1, %s655_s23  ;;  %s417_s8 = sshll.u32 (!%p115_p9), %s134_s7, 4  ;;  %s754_s8 = int_to_ptr.vmem [resolvable:$true] %s417_s8 }
  0x13   : > { %s591_s22 = scalar_lea.vmem (!%p115_p9), %s754_s8, 128 }
  0x14   : > { %509 = vmatpush3.bf16.msra.mxu0 (!%p115_p9), %v586_v1  ;;  %p592_p11 = scmp.ne.s32.totalorder (!%p115_p9), %s754_s8, %s591_s22 }
  0x15   : > { %s136_s26 = scalar_select %p135_p10, %s696_s13, 1  ;;  %522 = vmatprep.subr.bf16.mxu0 %v656_v2  ;;  %249 = vrot.lane.b32.xlu1 %v586_v1, %s658_s3 }
  0x16   : > { %p593_p12 = pnand %p592_p11, %p713_p5  ;;  %s659_s13 = smov [#allocation2]  }
  0x17   : > { %s481_s27 = sshll.u32 %s136_s26, 2  ;;  %s595_s23 = sshll.u32 %s659_s13, 4  ;;  %s596_s23 = int_to_ptr.vmem [resolvable:$false] %s595_s23 }
  0x18   : > { %s138_s30 = scalar_lea.vmem %s795_s0, %s481_s27  ;;  %p594_p13 = pneg %p593_p12 }
  0x19   : > { %v140_v3 = vld [vmem:[%s138_s30] sm:$0xf]  ;;  %s597_s24 = scalar_lea.vmem %s596_s23, 256  ;;  %p598_p0 = scmp.lt.s32.totalorder %s754_s8, %s596_s23 }
  0x1a   : > { %511 = vmatmul.mubr.msk.bf16.vlgmr.msra.gmra.mrb[0].mxu0 %vm157_vm1, %v140_v3  ;;  %p599_p1 = scmp.lt.s32.totalorder %s597_s24, %s591_s22 }
  0x1b   : > { %526 = vmatprep.mubr.msk.bf16.mxu0 %vm657_vm0, %v656_v2 }
  0x1c   : > { %p600_p2 = por %p599_p1, %p598_p0 }
  0x1e   : > { %p601_p3 = pnand %p600_p2, %p594_p13 }
  0x80   : > { %v202_v4 = vpop.permute.xlu0 %201 }
  0x81   : > { %515 = vmatpush3.bf16.msra.mxu1 %v202_v4 }
  0x82   : > { %516 = vmatprep.subr.bf16.mxu1 %v656_v2 }
  0x83   : > { %v248_v17 = vpop.permute.xlu1 %247 }
  0x84   : > { %v204_v5 = vpop.permute.xlu0 %203  ;;  %523 = vmatpush3.bf16.msra.mxu0 %v248_v17 }
  0x85   : > { %517 = vmatpush3.bf16.msra.mxu1 %v204_v5  ;;  %524 = vmatprep.subr.bf16.mxu0 %v656_v2 }
  0x86   : > { %530 = vmatprep.subr.bf16.mxu1 %v656_v2 }
  0x87   : > { %v250_v18 = vpop.permute.xlu1 %249 }
  0x88   : > { %519 = vmatmul.mubr.msk.bf16.vlgmr.msra.gmra.mrb[0].mxu1 %vm157_vm1, %v140_v3  ;;  %525 = vmatpush3.bf16.msra.mxu0 %v250_v18 }
  0x89   : > { %532 = vmatprep.mubr.msk.bf16.mxu1 %vm657_vm0, %v656_v2  ;;  %536 = vmatprep.subr.bf16.mxu0 %v656_v2 }
  0x8b   : > { %527 = vmatmul.mubr.msk.bf16.vlgmr.msra.gmra.mrb[4].mxu0 %vm157_vm1, %v140_v3 }
  0x8c   : > { %538 = vmatprep.mubr.msk.bf16.mxu0 %vm657_vm0, %v656_v2 }
  0xed   : > { %v195_v6 = vpop.f32.mrb[0].mxu0 }
  0xee   : > { %v512_v7 = vpop.f32.mrb[1].mxu0  ;;  %v293_v16 = vpack.c.bf16 %v195_v6, %v195_v6 }
  0xef   : > { %v198_v8 = vpop.f32.mrb[2].mxu0 }
  0xf0   : > { %v513_v9 = vpop.f32.mrb[3].mxu0 }
 0x15b   : > { %v241_v10 = vpop.f32.mrb[0].mxu1 }
 0x15c   : > { %v294_v11 = vpack.c.bf16 %v241_v10, %v241_v10  ;;  %v520_v12 = vpop.f32.mrb[1].mxu1 }
 0x15d   : > { %v244_v13 = vpop.f32.mrb[2].mxu1 }
 0x15e   : > { %v299_v14 = vsel %vm157_vm1, %v294_v11, 0  ;;  %v521_v15 = vpop.f32.mrb[3].mxu1  ;;  %v287_v29 = vpop.f32.mrb[4].mxu0 }
 0x15f   : > { %531 = vmatpush3.bf16.xpose.msra.mxu1 %v299_v14  ;;  %v528_v30 = vpop.f32.mrb[5].mxu0  ;;  %v354_v33 = vpack.c.bf16 %v287_v29, %v287_v29 }
 0x160   : > { %v290_v31 = vpop.f32.mrb[6].mxu0 }
 0x161   : > { %v529_v32 = vpop.f32.mrb[7].mxu0  ;;  %v360_v34 = vsel %vm358_vm3, %v354_v33, 0 }
 0x162   : > { %537 = vmatpush3.bf16.msra.mxu0 %v360_v34 }
 0x166   : > { %533 = vmatmul.mubr.msk.bf16.vlgmr.msra.gmra.mrb[4].mxu1 %vm157_vm1, %v293_v16 }
 0x239   : > { %v335_v19 = vpop.f32.mrb[4].mxu1 }
 0x23a   : > { %v534_v20 = vpop.f32.mrb[5].mxu1  ;;  %v342_v21 = vsel %vm341_vm2, %v335_v19, -inf }
 0x23b   : > { %343 = vmax.xlane.f32.xlu0 %v342_v21  ;;  %v338_v22 = vpop.f32.mrb[6].mxu1 }
 0x23c   : > { %v535_v23 = vpop.f32.mrb[7].mxu1 }
 0x2c8   : > { %v344_v24 = vpop.xlane.xlu0 %343 }
 0x2c9   : > { %v345_v25 = vsub.f32 %v335_v19, %v344_v24 }
 0x2cb   : > { %v346_v26 = vmul.f32 1.442695, %v345_v25 }
 0x2cd   : > { %587 = vpow2.f32 %v346_v26 }
 0x2d7   : > { %v588_v27 = vpop.eup %587 }
 0x2d8   : > { %v348_v28 = vsel %vm341_vm2, %v588_v27, 0.0 }
 0x2d9   : > { %349 = vadd.xlane.f32.xlu1 %v348_v28 }
 0x366   : > { %v350_v35 = vpop.xlane.xlu1 %349 }
 0x367   : > { %589 = vrcp.f32 %v350_v35 }
 0x371   : > { %v590_v36 = vpop.eup %589 }
 0x372   : > { %v352_v37 = vmul.f32 %v590_v36, %v588_v27 }
 0x374   : > { %v353_v38 = vpack.c.bf16 %v352_v37, %v352_v37 }
 0x376   : > { %539 = vmatmul.mubr.msk.bf16.vlgmr.msra.gmra.mrb[8].mxu0 %vm341_vm2, %v353_v38 }
 0x449   : > { %v396_v39 = vpop.f32.mrb[8].mxu0 }
 0x44a   : > { %402 = vst.msk [vmem:[%s134_s7] sm:$0xff] %vm157_vm1, %v396_v39  ;;  %v540_v40 = vpop.f32.mrb[9].mxu0 }
 0x44b   : > { %v399_v41 = vpop.f32.mrb[10].mxu0 }
 0x44c   : > { %604 = shalt.err (!%p601_p3)
}
 0x44d   : > { %s605_s25 = scalar_lea.hbm %s752_s17, 128  ;;  %s609_s28 = scalar_lea.hbm %s797_s2, 256 }
 0x44e   : > { %p606_p4 = scmp.ne.s32.totalorder %s752_s17, %s605_s25  ;;  %p610_p9 = scmp.lt.u32.totalorder %s752_s17, %s797_s2 }
 0x44f   : > { %p611_p10 = scmp.lt.u32.totalorder %s609_s28, %s605_s25  ;;  %p613_p12 = scmp.lt.u32.totalorder %s605_s25, %s752_s17 }
 0x450   : > { %p607_p7 = pnand %p606_p4, %p713_p5 }
 0x451   : > { %p612_p11 = por %p611_p10, %p610_p9 }
 0x452   : > { %p608_p8 = pneg %p607_p7 }
 0x453   : > { %p614_p13 = por %p613_p12, %p612_p11 }
 0x455   : > { %p615_p0 = pnand %p614_p13, %p608_p8 }
 0x457   : > { %618 = shalt.err (!%p615_p0)
}
 0x458   : > { %542 = dma.vmem_to_hbm [thread:$0]  (%p713_p5), %s754_s8, 128, %s752_s17, %s404_s21   ;;  %v541_v42 = vpop.f32.mrb[11].mxu0 }
 0x459 PF: > { %p548_p1 = scmp.ge.s32.totalorder %s653_s12, 2  ;;  %s429_s3 = sand.u32 1, %s641_s9  }
 0x45a   : > { %s430_s4 = scalar_lea.sflag [#allocation3], %s429_s3 }
 0x45b   : > { %p545_p2 = pnand %p548_p1, %p717_p6 }
 0x45d   : > { %636 = dma.done.wait (!%p545_p2), %s430_s4, 128  }
 0x45e   : > { %638 = vsyncadd (!%p545_p2), %s430_s4, 4294967168  ;;  %p12_p3 = scmp.ge.s32.totalorder %s700_s15, 4   ;;  %s800_s9 = smov %s645_s10 }
 0x45f   : > { %s801_s10 = smov %s649_s11  ;;  %s802_s11 = smov %s711_s18 }
 0x460   : > { %s803_s12 = smov %s700_s15  ;;  %14 = sbr.rel (!%p12_p3) target bundleno = 3 (0x3), region = 63 }
 0x467   :  { %435 = vsyncpa [#allocation3], 1 }
 0x468   :  { %437 = vsyncpa [#allocation3 + $0x1], 1 }

</bundles_post_ra>
